<compile_context>
chip_gen: v6e
topology: v6e:2x2x1
jax: 0.10.0
libtpu: 0.0.40
codegen_flags: <defaults>
</compile_context>

<pallas_src>
import functools

import jax
import jax.numpy as jnp
from jax.experimental import pallas as pl
from jax.experimental.pallas import tpu as pltpu


def _round_up(a, b):
    return (a + b - 1) // b * b


# ----------------------------------------------------------------------------
# Pallas kernel: one fused 1x1-conv matmul + per-head activations
# ----------------------------------------------------------------------------
def _pif_heads_kernel(ncls, nreg, o_reg, o_scl, with_scale,
                      x_ref, w_ref, b_ref, cls_ref, reg_ref, *scl_refs):
    # x_ref:   (1, C, T)   pixel tile in native NCHW order (bf16)
    # w_ref:   (R, C)      fused transposed weights, row-padded per head (bf16)
    # b_ref:   (R, 1)      fused biases (dilation already folded into reg rows)
    # outputs: (1, ncls, T), (1, nreg, T)[, (1, ncls, T)]  -- lane-dense
    x = x_ref[0]                                              # (C, T)
    w = w_ref[...]                                            # (R, C)
    if x.dtype != w.dtype:
        x = x.astype(w.dtype)
    y = jnp.dot(w, x, preferred_element_type=jnp.float32)     # MXU, f32 acc
    y = y + b_ref[...]                                        # (R, T)

    # sigmoid via exp + approximate reciprocal (keeps the divide on the EUP)
    y_cls = y[0:ncls]
    cls_ref[0] = pl.reciprocal(1.0 + jnp.exp(-y_cls),
                               approx=True).astype(cls_ref.dtype)
    reg_ref[0] = y[o_reg:o_reg + nreg].astype(reg_ref.dtype)  # dilation folded
    if with_scale:
        scl_ref = scl_refs[0]
        scl_ref[0] = jnp.maximum(y[o_scl:o_scl + ncls],
                                 0.0).astype(scl_ref.dtype)


# ----------------------------------------------------------------------------
# VMEM-aware tile selection
# ----------------------------------------------------------------------------
def _tpu_vmem_bytes():
    try:
        return int(pltpu.get_tpu_info().vmem_capacity_bytes)
    except Exception:
        return 64 * 1024 * 1024      # conservative (v7x per-core) fallback


def _pick_tile(hw, C, R, n_out_rows, x_bytes, phys_vmem):
    """Largest 128-multiple pixel tile whose VMEM footprint fits the budget."""
    budget = (phys_vmem * 3) // 4    # ~48 MiB on v7x, ~96 MiB on v5e/v6e
    # v7x-class chips (64 MiB/TC, 3.2 TB/s HBM) amortize per-step overhead
    # better with 4096-wide tiles when the budget permits.
    cands = ([4096] if phys_vmem <= (80 << 20) else []) + \
            [2048, 1024, 512, 256, 128]

    def est(t):
        return (2 * C * t * x_bytes          # double-buffered x tile
                + 2 * n_out_rows * t * 4     # double-buffered f32 outputs
                + 3 * R * t * 4              # y + activation temporaries
                + 2 * R * C * 2              # fused bf16 weights (dbl-buffered)
                + (2 << 20))                 # compiler scratch slack

    fitting = [c for c in cands if est(c) <= budget] or [128]
    T = fitting[-1]
    for c in fitting:                        # largest tile, <=12.5% edge waste
        if ((-hw) % c) * 8 <= max(hw, 1):
            T = c
            break
    vmem_limit = min(budget, max(2 * est(T), 32 << 20))
    return T, int(vmem_limit)


# ----------------------------------------------------------------------------
# pallas_call wrapper (pixels in lanes, ragged last tile handled by Pallas)
# ----------------------------------------------------------------------------
def pif_heads_pallas(x3, wT, bias, ncls, nreg, o_reg, o_scl, with_scale):
    """x3: (B, C, H*W) activations in native NCHW order (ideally bf16).
    wT: (R, C) fused transposed weights; bias: (R, 1) fused biases.
    Returns (cls, reg[, scale]) each of shape (B, n, H*W), float32."""
    B, C, HW = x3.shape
    R = wT.shape[0]
    n_out_rows = (2 * ncls + nreg) if with_scale else (ncls + nreg)

    T, vmem_limit = _pick_tile(HW, C, R, n_out_rows,
                               jnp.dtype(x3.dtype).itemsize, _tpu_vmem_bytes())
    n_tiles = pl.cdiv(HW, T)
    while B * n_tiles < 2 and T > 128:       # >=2 grid steps (v7x has 2 TCs)
        T //= 2
        n_tiles = pl.cdiv(HW, T)

    row_out = lambda n: pl.BlockSpec((1, n, T), lambda i, j: (i, 0, j))
    out_shapes = [jax.ShapeDtypeStruct((B, ncls, HW), jnp.float32),
                  jax.ShapeDtypeStruct((B, nreg, HW), jnp.float32)]
    out_specs = [row_out(ncls), row_out(nreg)]
    if with_scale:
        out_shapes.append(jax.ShapeDtypeStruct((B, ncls, HW), jnp.float32))
        out_specs.append(row_out(ncls))

    kernel = functools.partial(_pif_heads_kernel, ncls, nreg, o_reg, o_scl,
                               with_scale)

    return pl.pallas_call(
        kernel,
        out_shape=tuple(out_shapes),
        grid_spec=pltpu.PrefetchScalarGridSpec(
            num_scalar_prefetch=0,
            grid=(B, n_tiles),
            in_specs=[
                pl.BlockSpec((1, C, T), lambda i, j: (i, 0, j)),   # x tile
                pl.BlockSpec((R, C), lambda i, j: (0, 0)),         # fused W^T
                pl.BlockSpec((R, 1), lambda i, j: (0, 0)),         # fused bias
            ],
            out_specs=out_specs,
        ),
        compiler_params=pltpu.CompilerParams(
            dimension_semantics=("parallel", "parallel"),
            vmem_limit_bytes=vmem_limit),
    )(x3, wT, bias)


# ----------------------------------------------------------------------------
# dequad (quad > 0) -- single reshape/transpose interleave (plain-JAX glue)
# ----------------------------------------------------------------------------
def dequad(t):
    """Channel group g = 2*c + r of the 4-way split lands at output pixel
    (2h + r, 2w + c); the trailing odd row/column are cropped."""
    B, c4, H, W = t.shape
    n = c4 // 4
    g = t.reshape(B, 2, 2, n, H, W)               # axes: (B, c, r, n, H, W)
    full = jnp.transpose(g, (0, 3, 4, 2, 5, 1))   # (B, n, H, r, W, c)
    full = full.reshape(B, n, 2 * H, 2 * W)
    return full[:, :, :2 * H - 1, :2 * W - 1].astype(jnp.float32)


# Scatter-based dequad (matches the torch implementation 1:1) for verification.
def _dequad_ref(t):
    n = t.shape[1] // 4
    B, _, H, W = t.shape
    o = jnp.zeros((B, n, H * 2 - 1, W * 2 - 1), jnp.float32)
    o = o.at[:, :, 0::2, 0::2].set(t[:, 0:n])
    o = o.at[:, :, 1::2, 0::2].set(t[:, n:2 * n, :-1, :])
    o = o.at[:, :, 0::2, 1::2].set(t[:, 2 * n:3 * n, :, :-1])
    o = o.at[:, :, 1::2, 1::2].set(t[:, 3 * n:4 * n, :-1, :-1])
    return o


# ----------------------------------------------------------------------------
# jitted forward (so the bf16 cast / reshapes / dequad fuse)
# ----------------------------------------------------------------------------
@functools.partial(jax.jit, static_argnums=(3, 4, 5, 6, 7, 8))
def _forward(x_nchw, wT, bias, ncls, nreg, o_reg, o_scl, with_scale, quad):
    # Dropout2d with p=0.0 (eval) is identity.
    B, C, H, W = x_nchw.shape
    x3 = x_nchw.reshape(B, C, H * W).astype(wT.dtype)  # bf16 at HBM boundary
    outs = pif_heads_pallas(x3, wT, bias, ncls, nreg, o_reg, o_scl, with_scale)

    class_x = outs[0].reshape(B, ncls, H, W)
    reg_x = outs[1].reshape(B, nreg, H, W)
    scale_x = outs[2].reshape(B, ncls, H, W) if with_scale else None

    for _ in range(quad):
        class_x = dequad(class_x)
        reg_x = dequad(reg_x)
        if scale_x is not None:
            scale_x = dequad(scale_x)

    reg_x = reg_x.reshape(reg_x.shape[0], reg_x.shape[1] // 2, 2,
                          reg_x.shape[2], reg_x.shape[3])
    out = [class_x, reg_x]
    if with_scale:
        out.append(scale_x)
    return tuple(out)


# ----------------------------------------------------------------------------
# Module wrapper
# ----------------------------------------------------------------------------
class PartIntensityFields:
    def __init__(self, n_parts, in_features, key, dropout_p=0.0, quad=0,
                 with_scale=False):
        self.dilation = 1.0
        self._quad = quad
        self.with_scale = with_scale
        self._ncls = n_parts * 4 ** quad
        self._nreg = n_parts * 2 * 4 ** quad
        self._o_reg = _round_up(self._ncls, 8)
        self._o_scl = self._o_reg + _round_up(self._nreg, 8)
        self._R = self._o_scl + (_round_up(self._ncls, 8) if with_scale else 0)

        k = jax.random.split(key, 6)
        bound = 1.0 / (in_features ** 0.5)
        # class_conv: torch default (kaiming-uniform-ish) synthetic init
        self.wc = jax.random.uniform(k[0], (in_features, self._ncls),
                                     jnp.float32, -bound, bound)
        self.bc = jax.random.uniform(k[1], (self._ncls,), jnp.float32,
                                     -bound, bound)
        # reg_conv: normal(std=0.01) as in the torch module
        self.wr = 0.01 * jax.random.normal(k[2], (in_features, self._nreg),
                                           jnp.float32)
        self.br = 0.01 * jax.random.normal(k[3], (self._nreg,), jnp.float32)
        # scale_conv (only used if with_scale)
        if with_scale:
            self.ws = jax.random.uniform(k[4], (in_features, self._ncls),
                                         jnp.float32, -bound, bound)
            self.bs = jax.random.uniform(k[5], (self._ncls,), jnp.float32,
                                         -bound, bound)
        else:
            self.ws = None
            self.bs = None

        self._fused_cache = None    # (dilation, wT_bf16, bias_f32)

    # --- fuse the heads once: concatenated, sublane-padded W^T / bias -------
    def _fuse_heads(self):
        ncls, nreg = self._ncls, self._nreg
        o_reg, o_scl, R = self._o_reg, self._o_scl, self._R
        C = self.wc.shape[0]
        wT = jnp.zeros((R, C), jnp.float32)
        wT = wT.at[0:ncls].set(self.wc.T)
        wT = wT.at[o_reg:o_reg + nreg].set(self.wr.T * self.dilation)
        b = jnp.zeros((R, 1), jnp.float32)
        b = b.at[0:ncls, 0].set(self.bc)
        b = b.at[o_reg:o_reg + nreg, 0].set(self.br * self.dilation)
        if self.with_scale:
            wT = wT.at[o_scl:o_scl + ncls].set(self.ws.T)
            b = b.at[o_scl:o_scl + ncls, 0].set(self.bs)
        return wT.astype(jnp.bfloat16), b

    def _fused_params(self):
        if self._fused_cache is None or self._fused_cache[0] != self.dilation:
            wT, b = self._fuse_heads()
            self._fused_cache = (self.dilation, wT, b)
        return self._fused_cache[1], self._fused_cache[2]

    def __call__(self, x_nchw):
        wT, bias = self._fused_params()
        return list(_forward(x_nchw, wT, bias, self._ncls, self._nreg,
                             self._o_reg, self._o_scl, self.with_scale,
                             self._quad))


# ----------------------------------------------------------------------------
# Pure-JAX reference for verification (mirrors the torch forward exactly, f32)
# ----------------------------------------------------------------------------
def _reference(module, x_nchw):
    B, C, H, W = x_nchw.shape
    hp = jax.lax.Precision.HIGHEST
    x2d = jnp.transpose(x_nchw, (0, 2, 3, 1)).reshape(B * H * W, C)

    def to_nchw(t2d):
        n = t2d.shape[1]
        return jnp.transpose(t2d.reshape(B, H, W, n), (0, 3, 1, 2))

    cls = jax.nn.sigmoid(jnp.dot(x2d, module.wc, precision=hp) + module.bc)
    reg = (jnp.dot(x2d, module.wr, precision=hp) + module.br) * module.dilation
    class_x, reg_x = to_nchw(cls), to_nchw(reg)
    scale_x = None
    if module.with_scale:
        scl = jnp.maximum(jnp.dot(x2d, module.ws, precision=hp) + module.bs, 0.0)
        scale_x = to_nchw(scl)

    for _ in range(module._quad):
        class_x = _dequad_ref(class_x)
        reg_x = _dequad_ref(reg_x)
        if scale_x is not None:
            scale_x = _dequad_ref(scale_x)

    reg_x = reg_x.reshape(reg_x.shape[0], reg_x.shape[1] // 2, 2,
                          reg_x.shape[2], reg_x.shape[3])
    out = [class_x, reg_x]
    if module.with_scale:
        out.append(scale_x)
    return out


if __name__ == "__main__":
    key = jax.random.PRNGKey(0)
    kx, kp1, kp2, kp3 = jax.random.split(key, 4)

    def run_case(n_parts, quad, with_scale, kparam, H=16, W=16):
        B, C = 2, 32
        x = jax.random.normal(kx, (B, C, H, W), jnp.float32)
        module = PartIntensityFields(n_parts, C, kparam, quad=quad,
                                     with_scale=with_scale)
        outs = jax.block_until_ready(module(x))
        refs = _reference(module, x)
        assert len(outs) == len(refs)
        for got, ref in zip(outs, refs):
            assert got.shape == ref.shape, (got.shape, ref.shape)
            err = float(jnp.max(jnp.abs(got.astype(jnp.float32) - ref)))
            # bf16 streaming + approx reciprocal -> relaxed tolerance
            assert err < 1.5e-2, ("max abs err", err, got.shape)

    run_case(5, 0, True, kp1)           # class + reg + scale heads
    run_case(5, 0, False, kp2, W=15)    # no scale head; ragged HW (240) tile
    run_case(3, 1, True, kp3)           # quad > 0 path exercises dequad

    print("KERNEL_OK")
</pallas_src>

<mosaic_0001>
module attributes {stable_mosaic.version = 11 : i64} {
  func.func @_pif_heads_kernel(%arg0: i32, %arg1: i32, %arg2: memref<1x32x256xbf16, #tpu.memory_space<vmem>>, %arg3: memref<32x32xbf16, #tpu.memory_space<vmem>>, %arg4: memref<32x1xf32, #tpu.memory_space<vmem>>, %arg5: memref<1x5x256xf32, #tpu.memory_space<vmem>>, %arg6: memref<1x10x256xf32, #tpu.memory_space<vmem>>, %arg7: memref<1x5x256xf32, #tpu.memory_space<vmem>>) attributes {dimension_semantics = [#tpu.dimension_semantics<parallel>, #tpu.dimension_semantics<parallel>], iteration_bounds = array<i64: 2, 1>, scalar_prefetch = 0 : i64, scratch_operands = 0 : i64, tpu.core_type = #tpu.core_type<tc>, window_params = [{transform_indices = @transform_0, window_bounds = array<i64: 1, 32, 256>}, {pipeline_mode = #tpu.pipeline_mode<synchronous>, transform_indices = @transform_1, window_bounds = array<i64: 32, 32>}, {pipeline_mode = #tpu.pipeline_mode<synchronous>, transform_indices = @transform_2, window_bounds = array<i64: 32, 1>}, {transform_indices = @transform_3, window_bounds = array<i64: 1, 5, 256>}, {transform_indices = @transform_4, window_bounds = array<i64: 1, 10, 256>}, {transform_indices = @transform_5, window_bounds = array<i64: 1, 5, 256>}]} {
    %c0 = arith.constant 0 : index
    %c0_0 = arith.constant 0 : index
    %c0_1 = arith.constant 0 : index
    %0 = vector.load %arg2[%c0, %c0_0, %c0_1] : memref<1x32x256xbf16, #tpu.memory_space<vmem>>, vector<1x32x256xbf16>
    %1 = vector.shape_cast %0 : vector<1x32x256xbf16> to vector<32x256xbf16>
    %c0_2 = arith.constant 0 : index
    %c0_3 = arith.constant 0 : index
    %2 = vector.load %arg3[%c0_2, %c0_3] : memref<32x32xbf16, #tpu.memory_space<vmem>>, vector<32x32xbf16>
    %cst = arith.constant dense<0.000000e+00> : vector<32x256xf32>
    %3 = tpu.matmul %2, %1, %cst {dimension_numbers = #tpu.dot_dimension_numbers<[1], [0], [0], [1], [0, 0, 1, 1], [], []>} : vector<32x32xbf16>, vector<32x256xbf16>, vector<32x256xf32> -> vector<32x256xf32>
    %c0_4 = arith.constant 0 : index
    %c0_5 = arith.constant 0 : index
    %4 = vector.load %arg4[%c0_4, %c0_5] : memref<32x1xf32, #tpu.memory_space<vmem>>, vector<32x1xf32>
    %5 = vector.broadcast %4 : vector<32x1xf32> to vector<32x256xf32>
    %6 = arith.addf %3, %5 : vector<32x256xf32>
    %7 = vector.extract_strided_slice %6 {offsets = [0, 0], sizes = [5, 256], strides = [1, 1]} : vector<32x256xf32> to vector<5x256xf32>
    %cst_6 = arith.constant 0.000000e+00 : f32
    %8 = vector.broadcast %cst_6 : f32 to vector<5x256xf32>
    %9 = arith.subf %8, %7 : vector<5x256xf32>
    %10 = math.exp %9 : vector<5x256xf32>
    %cst_7 = arith.constant 1.000000e+00 : f32
    %11 = vector.broadcast %cst_7 : f32 to vector<5x256xf32>
    %12 = arith.addf %11, %10 : vector<5x256xf32>
    %13 = tpu.reciprocal %12 {approx = true} : vector<5x256xf32> -> vector<5x256xf32>
    %c0_8 = arith.constant 0 : index
    %c0_9 = arith.constant 0 : index
    %c0_10 = arith.constant 0 : index
    %14 = vector.load %arg5[%c0_8, %c0_9, %c0_10] : memref<1x5x256xf32, #tpu.memory_space<vmem>>, vector<1x5x256xf32>
    %15 = vector.shape_cast %14 : vector<1x5x256xf32> to vector<5x256xf32>
    %16 = vector.shape_cast %13 : vector<5x256xf32> to vector<1x5x256xf32>
    tpu.vector_store %arg5[%c0_8, %c0_9, %c0_10], %16 {strides = array<i32>} : memref<1x5x256xf32, #tpu.memory_space<vmem>>, vector<1x5x256xf32>,
    %17 = vector.extract_strided_slice %6 {offsets = [8, 0], sizes = [10, 256], strides = [1, 1]} : vector<32x256xf32> to vector<10x256xf32>
    %c0_11 = arith.constant 0 : index
    %c0_12 = arith.constant 0 : index
    %c0_13 = arith.constant 0 : index
    %18 = vector.load %arg6[%c0_11, %c0_12, %c0_13] : memref<1x10x256xf32, #tpu.memory_space<vmem>>, vector<1x10x256xf32>
    %19 = vector.shape_cast %18 : vector<1x10x256xf32> to vector<10x256xf32>
    %20 = vector.shape_cast %17 : vector<10x256xf32> to vector<1x10x256xf32>
    tpu.vector_store %arg6[%c0_11, %c0_12, %c0_13], %20 {strides = array<i32>} : memref<1x10x256xf32, #tpu.memory_space<vmem>>, vector<1x10x256xf32>,
    %21 = vector.extract_strided_slice %6 {offsets = [24, 0], sizes = [5, 256], strides = [1, 1]} : vector<32x256xf32> to vector<5x256xf32>
    %cst_14 = arith.constant 0.000000e+00 : f32
    %22 = vector.broadcast %cst_14 : f32 to vector<5x256xf32>
    %23 = arith.maximumf %21, %22 : vector<5x256xf32>
    %c0_15 = arith.constant 0 : index
    %c0_16 = arith.constant 0 : index
    %c0_17 = arith.constant 0 : index
    %24 = vector.load %arg7[%c0_15, %c0_16, %c0_17] : memref<1x5x256xf32, #tpu.memory_space<vmem>>, vector<1x5x256xf32>
    %25 = vector.shape_cast %24 : vector<1x5x256xf32> to vector<5x256xf32>
    %26 = vector.shape_cast %23 : vector<5x256xf32> to vector<1x5x256xf32>
    tpu.vector_store %arg7[%c0_15, %c0_16, %c0_17], %26 {strides = array<i32>} : memref<1x5x256xf32, #tpu.memory_space<vmem>>, vector<1x5x256xf32>,
    return
  }
  func.func @transform_0(%arg0: i32, %arg1: i32) -> (i32, i32, i32) {
    %c0_i32 = arith.constant 0 : i32
    %c0_i32_0 = arith.constant 0 : i32
    return %arg0, %c0_i32, %arg1 : i32, i32, i32
  }
  func.func @transform_1(%arg0: i32, %arg1: i32) -> (i32, i32) {
    %c0_i32 = arith.constant 0 : i32
    %c0_i32_0 = arith.constant 0 : i32
    %c0_i32_1 = arith.constant 0 : i32
    return %c0_i32, %c0_i32_0 : i32, i32
  }
  func.func @transform_2(%arg0: i32, %arg1: i32) -> (i32, i32) {
    %c0_i32 = arith.constant 0 : i32
    %c0_i32_0 = arith.constant 0 : i32
    %c0_i32_1 = arith.constant 0 : i32
    return %c0_i32, %c0_i32_0 : i32, i32
  }
  func.func @transform_3(%arg0: i32, %arg1: i32) -> (i32, i32, i32) {
    %c0_i32 = arith.constant 0 : i32
    %c0_i32_0 = arith.constant 0 : i32
    return %arg0, %c0_i32, %arg1 : i32, i32, i32
  }
  func.func @transform_4(%arg0: i32, %arg1: i32) -> (i32, i32, i32) {
    %c0_i32 = arith.constant 0 : i32
    %c0_i32_0 = arith.constant 0 : i32
    return %arg0, %c0_i32, %arg1 : i32, i32, i32
  }
  func.func @transform_5(%arg0: i32, %arg1: i32) -> (i32, i32, i32) {
    %c0_i32 = arith.constant 0 : i32
    %c0_i32_0 = arith.constant 0 : i32
    return %arg0, %c0_i32, %arg1 : i32, i32, i32
  }
}

</mosaic_0001>

<bundles_post_ra>
// kernel: _forward.1
= control target key start
LH: loop header
LB: loop body
LE: loop exit
PB: predicated region body
PF: predicated region fallthrough
CT: control target
= control target key end

     0   :  { %s770_s18 = smov 0   ;;  %s772_s19 = smov 0   ;;  %s839_s0 = inlined_call_operand.vmem [shape: bf16[2,32,256], index: 0, kind: input, shape index: {}]   ;;  %s840_s1 = inlined_call_operand.vmem [shape: bf16[32,32], index: 1, kind: input, shape index: {}]   ;;  %s841_s2 = inlined_call_operand.vmem [shape: f32[32,1], index: 2, kind: input, shape index: {}]   ;;  %s842_s3 = inlined_call_operand.vmem [shape: f32[2,5,256], index: 3, kind: output, shape index: {0}]   ;;  %s843_s4 = inlined_call_operand.vmem [shape: f32[2,10,256], index: 4, kind: output, shape index: {1}]   ;;  %s844_s5 = inlined_call_operand.vmem [shape: f32[2,5,256], index: 5, kind: output, shape index: {2}]  }
   0x1   :  { %s774_s20 = smov 0  }
   0x2 LB: > { %s28_s21 = sadd.s32 1, %s733_s19  ;;  %p645_p0 = scmp.ge.s32.totalorder %s737_s20, 1  ;;  %s737_s20 = sphi %s774_s20, %s16_s20   ;;  %s733_s19 = sphi %s772_s19, %s846_s19   ;;  %s729_s18 = sphi %s770_s18, %s845_s18  }
   0x3   : > { %p30_p1 = scmp.ge.s32.totalorder %s28_s21, 2  ;;  %p217_p2 = scmp.lt.s32.totalorder %s737_s20, 3 }
   0x5   : > { %s848_s21 = smov (%p30_p1, %s28_s21), 0  ;;  %p218_p3 = pnand %p645_p0, %p217_p2 }
   0x6   : > { %p272_p4 = scmp.lt.s32.totalorder (!%p218_p3), %s729_s18, 1 }
   0x7   : > { %221 = sbr.rel (%p218_p3) target bundleno = 256 (0x100), region = 32 }
   0xc   : > { %v739_v0 = vmov 0   ;;  %s850_s18 = smov (!%p272_p4, %s729_s18), 1  ;;  %v320_v1 = vld [vmem:[%s841_s2] sm:$0xff]  ;;  %v321_v2 = vld [vmem:[%s841_s2 + $0x8] sm:$0xff]  ;;  %v323_v3 = vld [vmem:[%s841_s2 + $0x18] sm:$0xff]  ;;  %vm374_vm0 = vcmask 261120  }
   0xd   : > { %413 = vmatprep.mubr.bf16.mxu0 %v739_v0  ;;  %423 = vmatprep.mubr.bf16.mxu1 %v739_v0  ;;  %s664_s26 = sshll.u32 %s850_s18, 5  ;;  %v322_v7 = vld [vmem:[%s841_s2 + $0x10] sm:$0xff]  ;;  %v705_v9 = vld [vmem:[%s840_s1] sm:$0xff]   ;;  %v706_v10 = vld [vmem:[%s840_s1 + $0x8] sm:$0xff]   ;;  %s665_s16 = sshll.u32 %s850_s18, 4 }
   0xe   : > { %697 = vset.pattern.permute.xlu0 %v739_v0  ;;  %698 = vset.pattern.permute.xlu1 %v739_v0  ;;  %s279_s6 = scalar_lea.vmem %s839_s0, %s664_s26  ;;  %s299_s15 = scalar_lea.vmem %s843_s4, %s664_s26 }
   0xf   : > { %326 = vperm.xlu0 %697, %v320_v1   ;;  %331 = vperm.xlu1 %698, %v321_v2   ;;  %v699_v4 = vld [vmem:[%s279_s6 + $0x14] ss:$8 sps:$4 sm:$0xff]   ;;  %v701_v5 = vld [vmem:[%s279_s6 + $0x10] ss:$8 sps:$4 sm:$0xff]   ;;  %v702_v6 = vld [vmem:[%s279_s6 + $0x4] ss:$8 sps:$4 sm:$0xff]   ;;  %s309_s23 = scalar_lea.vmem %s844_s5, %s665_s16  ;;  %s289_s26 = scalar_lea.vmem %s842_s3, %s665_s16 }
  0x10   : > { %393 = vmatprep.subr.bf16.mxu0 %v699_v4  ;;  %668 = vmatprep.subr.bf16.mxu1 %v699_v4  ;;  %v704_v8 = vld [vmem:[%s279_s6] ss:$8 sps:$4 sm:$0xff]  }
  0x11   : > { %394 = vmatpush1.bf16.msra.mxu0 %v701_v5  ;;  %670 = vmatpush1.bf16.msra.mxu1 %v701_v5 }
  0x12   : > { %395 = vmatprep.subr.bf16.mxu0 %v702_v6  ;;  %669 = vmatprep.subr.bf16.mxu1 %v702_v6 }
  0x13   : > { %341 = vperm.xlu0 %697, %v323_v3   ;;  %336 = vperm.xlu1 %698, %v322_v7  }
  0x15   : > { %396 = vmatpush1.bf16.msra.mxu0 %v704_v8  ;;  %671 = vmatpush1.bf16.msra.mxu1 %v704_v8 }
  0x18   : > { %660 = vmatmul.mubr.msk.bf16.vlgmr.msra.gmra.mxu0 %vm374_vm0, %v705_v9  ;;  %661 = vmatmul.mubr.msk.bf16.vlgmr.msra.gmra.mxu1 %vm374_vm0, %v706_v10 }
  0x8a   : > { %v332_v11 = vpop.permute.xlu1 %331  ;;  %v327_v12 = vpop.permute.xlu0 %326 }
  0x8e   : > { %v337_v13 = vpop.permute.xlu1 %336  ;;  %v342_v21 = vpop.permute.xlu0 %341 }
  0xd8   : > { %v415_v14 = vpop.f32.mrf.mxu0  ;;  %v425_v15 = vpop.f32.mrf.mxu1 }
  0xd9   : > { %v416_v16 = vadd.f32 %v415_v14, %v327_v12  ;;  %v426_v17 = vadd.f32 %v425_v15, %v337_v13 }
  0xda   : > { %v417_v18 = vpop.f32.mrf.mxu0  ;;  %v427_v19 = vpop.f32.mrf.mxu1 }
  0xdb   : > { %v434_v20 = vsub.f32 0.0, %v416_v16  ;;  %v418_v22 = vadd.f32 %v417_v18, %v327_v12  ;;  %v428_v23 = vadd.f32 %v427_v19, %v337_v13  ;;  %448 = vst [vmem:[%s299_s15 + $0x10] sm:$0x3] %v426_v17 }
  0xdc   : > { %v419_v24 = vpop.f32.mrf.mxu0  ;;  %v429_v25 = vpop.f32.mrf.mxu1 }
  0xdd   : > { %v436_v26 = vmul.f32 1.442695, %v434_v20  ;;  %v435_v27 = vsub.f32 0.0, %v418_v22  ;;  %v420_v28 = vadd.f32 %v419_v24, %v332_v11  ;;  %v430_v29 = vadd.f32 %v429_v25, %v342_v21  ;;  %449 = vst [vmem:[%s299_s15 + $0x18] sm:$0x3] %v428_v23 }
  0xde   : > { %v421_v30 = vpop.f32.mrf.mxu0  ;;  %v431_v31 = vpop.f32.mrf.mxu1 }
  0xdf   : > { %707 = vpow2.f32 %v436_v26  ;;  %v438_v32 = vmul.f32 1.442695, %v435_v27  ;;  %446 = vst [vmem:[%s299_s15] sm:$0xff] %v420_v28  ;;  %v450_v33 = vmax.f32 %v430_v29, 0.0  ;;  %v422_v34 = vadd.f32 %v421_v30, %v332_v11 }
  0xe0   : > { %v432_v35 = vadd.f32 %v431_v31, %v342_v21 }
  0xe1   : > { %709 = vpow2.f32 %v438_v32  ;;  %452 = vst [vmem:[%s309_s23] sm:$0x1f] %v450_v33  ;;  %447 = vst [vmem:[%s299_s15 + $0x8] sm:$0xff] %v422_v34 }
  0xe2   : > { %v451_v36 = vmax.f32 %v432_v35, 0.0 }
  0xe4   : > { %453 = vst [vmem:[%s309_s23 + $0x8] sm:$0x1f] %v451_v36 }
  0xec   : > { %v708_v37 = vpop.eup %707 }
  0xed   : > { %v440_v38 = vadd.f32 1.0, %v708_v37 }
  0xee   : > { %v710_v39 = vpop.eup %709 }
  0xef   : > { %711 = vrcp.f32 %v440_v38  ;;  %v441_v40 = vadd.f32 1.0, %v710_v39 }
  0xf1   : > { %713 = vrcp.f32 %v441_v40 }
  0xfc   : > { %v712_v41 = vpop.eup %711 }
  0xfd   : > { %444 = vst [vmem:[%s289_s26] sm:$0x1f] %v712_v41 }
  0xfe   : > { %v714_v42 = vpop.eup %713 }
  0xff   : > { %445 = vst [vmem:[%s289_s26 + $0x8] sm:$0x1f] %v714_v42 }
 0x100 PF: > { %s16_s20 = sadd.s32 1, %s737_s20   ;;  %s845_s18 = smov %s733_s19 }
 0x101   : > { %p13_p5 = scmp.ge.s32.totalorder %s16_s20, 4   ;;  %s846_s19 = smov %s848_s21 }
 0x103   :  { %15 = sbr.rel (!%p13_p5) target bundleno = 2 (0x2), region = 86 }

</bundles_post_ra>
